<compile_context>
chip_gen: v7x
topology: tpu7x:2x2x1
jax: 0.10.0
libtpu: 0.0.40
codegen_flags: <defaults>
</compile_context>

<pallas_src>
import jax
import jax.numpy as jnp
from jax.experimental import pallas as pl
from jax.experimental.pallas import tpu as pltpu

_VMEM_BUDGET = 48 * 1024 * 1024      # tile budget: fits v7x's 64 MiB VMEM
_VMEM_LIMIT_CAP = 56 * 1024 * 1024   # < 64 MiB -> legal on v5e/v6e/v7x


def _round_up(x, m):
    return (x + m - 1) // m * m


def _decoder_kernel(z_ref, w1_ref, b1_ref, w2_ref, b2_ref, logits_ref):
    # net_hidden: Linear(z_dim -> h_dim) + ReLU, f32 accumulation on the MXU.
    h = jnp.dot(z_ref[...], w1_ref[...], preferred_element_type=jnp.float32)
    h = jnp.maximum(h + b1_ref[...], 0.0)
    # net_logits: Linear(h_dim -> x_dim), f32 accumulation.
    logits = jnp.dot(h.astype(w2_ref.dtype), w2_ref[...],
                     preferred_element_type=jnp.float32)
    logits = logits + b2_ref[...]
    # Lane-dense full-width store (x_dim is a multiple of 128).
    logits_ref[...] = logits.astype(logits_ref.dtype)


def decoder_forward(z, w1, b1, w2, b2, *, block_b=512,
                    compute_dtype=None, out_dtype=None):
    """Fused Decoder.forward: returns the Bernoulli logits (B, x_dim)."""
    B, Zd = z.shape
    H = w1.shape[1]
    X = w2.shape[1]

    out_dtype = jnp.dtype(out_dtype) if out_dtype is not None else jnp.dtype(z.dtype)

    # Biases must be rank-2 (1, H) / (1, X) so they match the BlockSpec rank.
    b1 = b1.reshape(1, H)
    b2 = b2.reshape(1, X)

    # Optional bf16 MXU path (weights/activations cast caller-side; biases and
    # the accumulation stay f32).
    if compute_dtype is not None:
        z = z.astype(compute_dtype)
        w1 = w1.astype(compute_dtype)
        w2 = w2.astype(compute_dtype)

    # ---- batch-tile selection ------------------------------------------
    if B <= 8:
        tb = B                                   # full-extent block, one step
    else:
        # At least 2 grid steps so v7x's second TensorCore gets a tile; cap at
        # block_b (512-row tiles reach ~85% of the HBM roofline).
        tb = min(block_b, _round_up(pl.cdiv(B, 2), 8))
        # Align large tiles to the MXU M-strip.
        if tb >= 256:
            tb = (tb // 256) * 256
        elif tb >= 128:
            tb = (tb // 128) * 128

    # ---- VMEM accounting ------------------------------------------------
    in_bytes = jnp.dtype(z.dtype).itemsize
    w_bytes = jnp.dtype(w1.dtype).itemsize
    b_bytes = jnp.dtype(b1.dtype).itemsize
    out_bytes = out_dtype.itemsize

    def vmem_bytes(t):
        resident = (Zd * H + H * X) * w_bytes + (H + X) * b_bytes   # single-buffered
        io = 2 * t * Zd * in_bytes + 2 * t * X * out_bytes          # double-buffered
        return resident + io

    while tb > 8 and vmem_bytes(tb) > _VMEM_BUDGET:
        tb = max(8, _round_up(tb // 2, 8))

    vmem_limit = int(min(max(vmem_bytes(tb) + (8 << 20), 32 << 20), _VMEM_LIMIT_CAP))

    grid = (pl.cdiv(B, tb),)
    resident = dict(pipeline_mode=pl.Buffered(1))   # constant index_map -> 1 copy

    return pl.pallas_call(
        _decoder_kernel,
        out_shape=jax.ShapeDtypeStruct((B, X), out_dtype),
        grid_spec=pltpu.PrefetchScalarGridSpec(
            num_scalar_prefetch=0,
            grid=grid,
            in_specs=[
                pl.BlockSpec((tb, Zd), lambda i: (i, 0)),             # z batch tile
                pl.BlockSpec((Zd, H), lambda i: (0, 0), **resident),  # W1 resident
                pl.BlockSpec((1, H), lambda i: (0, 0), **resident),   # b1 resident
                pl.BlockSpec((H, X), lambda i: (0, 0), **resident),   # W2 resident
                pl.BlockSpec((1, X), lambda i: (0, 0), **resident),   # b2 resident
            ],
            out_specs=pl.BlockSpec((tb, X), lambda i: (i, 0)),
        ),
        compiler_params=pltpu.CompilerParams(
            dimension_semantics=("parallel",),
            vmem_limit_bytes=vmem_limit,
        ),
    )(z, w1, b1, w2, b2)


if __name__ == "__main__":
    key = jax.random.PRNGKey(0)
    # Small shapes implied by the Decoder forward:
    #   batch=2 latents of z_dim=8 -> hidden=32 -> x_dim=256 Bernoulli logits.
    batch, z_dim, h_dim, x_dim = 2, 8, 32, 256
    k1, k2, k3, k4, k5 = jax.random.split(key, 5)

    z = jax.random.normal(k1, (batch, z_dim), dtype=jnp.float32)
    w1 = jax.random.normal(k2, (z_dim, h_dim), dtype=jnp.float32) * 0.1
    b1 = jax.random.normal(k3, (h_dim,), dtype=jnp.float32) * 0.1
    w2 = jax.random.normal(k4, (h_dim, x_dim), dtype=jnp.float32) * 0.1
    b2 = jax.random.normal(k5, (x_dim,), dtype=jnp.float32) * 0.1

    def ref_logits(z_, w1_, b1_, w2_, b2_):
        h = jnp.maximum(z_ @ w1_ + b1_, 0.0)
        return h @ w2_ + b2_

    # 1) Small single-block case (grid length 1, full-extent batch block).
    logits = jax.block_until_ready(decoder_forward(z, w1, b1, w2, b2))
    expect = ref_logits(z, w1, b1, w2, b2)
    assert logits.shape == expect.shape, (logits.shape, expect.shape)
    assert logits.dtype == expect.dtype
    assert bool(jnp.allclose(logits, expect, atol=1e-5, rtol=1e-5))

    # 2) Larger batch to exercise the multi-tile (megacore-shardable) path.
    zb = jax.random.normal(k1, (512, z_dim), dtype=jnp.float32)
    logits_b = jax.block_until_ready(decoder_forward(zb, w1, b1, w2, b2))
    expect_b = ref_logits(zb, w1, b1, w2, b2)
    assert bool(jnp.allclose(logits_b, expect_b, atol=1e-4, rtol=1e-4))

    print("KERNEL_OK")
</pallas_src>

<mosaic_0001>
module attributes {stable_mosaic.version = 11 : i64} {
  func.func @_decoder_kernel(%arg0: i32, %arg1: memref<2x8xf32, #tpu.memory_space<vmem>>, %arg2: memref<8x32xf32, #tpu.memory_space<vmem>>, %arg3: memref<1x32xf32, #tpu.memory_space<vmem>>, %arg4: memref<32x256xf32, #tpu.memory_space<vmem>>, %arg5: memref<1x256xf32, #tpu.memory_space<vmem>>, %arg6: memref<2x256xf32, #tpu.memory_space<vmem>>) attributes {dimension_semantics = [#tpu.dimension_semantics<parallel>], iteration_bounds = array<i64: 1>, scalar_prefetch = 0 : i64, scratch_operands = 0 : i64, tpu.core_type = #tpu.core_type<tc>, window_params = [{transform_indices = @transform_0, window_bounds = array<i64: 2, 8>}, {pipeline_mode = #tpu.pipeline_mode<synchronous>, transform_indices = @transform_1, window_bounds = array<i64: 8, 32>}, {pipeline_mode = #tpu.pipeline_mode<synchronous>, transform_indices = @transform_2, window_bounds = array<i64: 1, 32>}, {pipeline_mode = #tpu.pipeline_mode<synchronous>, transform_indices = @transform_3, window_bounds = array<i64: 32, 256>}, {pipeline_mode = #tpu.pipeline_mode<synchronous>, transform_indices = @transform_4, window_bounds = array<i64: 1, 256>}, {transform_indices = @transform_5, window_bounds = array<i64: 2, 256>}]} {
    %c0 = arith.constant 0 : index
    %c0_0 = arith.constant 0 : index
    %0 = vector.load %arg1[%c0, %c0_0] : memref<2x8xf32, #tpu.memory_space<vmem>>, vector<2x8xf32>
    %c0_1 = arith.constant 0 : index
    %c0_2 = arith.constant 0 : index
    %1 = vector.load %arg2[%c0_1, %c0_2] : memref<8x32xf32, #tpu.memory_space<vmem>>, vector<8x32xf32>
    %cst = arith.constant dense<0.000000e+00> : vector<2x32xf32>
    %2 = tpu.matmul %0, %1, %cst {dimension_numbers = #tpu.dot_dimension_numbers<[1], [0], [0], [1], [0, 0, 1, 1], [], []>} : vector<2x8xf32>, vector<8x32xf32>, vector<2x32xf32> -> vector<2x32xf32>
    %c0_3 = arith.constant 0 : index
    %c0_4 = arith.constant 0 : index
    %3 = vector.load %arg3[%c0_3, %c0_4] : memref<1x32xf32, #tpu.memory_space<vmem>>, vector<1x32xf32>
    %4 = vector.broadcast %3 : vector<1x32xf32> to vector<2x32xf32>
    %5 = arith.addf %2, %4 : vector<2x32xf32>
    %cst_5 = arith.constant 0.000000e+00 : f32
    %6 = vector.broadcast %cst_5 : f32 to vector<2x32xf32>
    %7 = arith.maximumf %5, %6 : vector<2x32xf32>
    %c0_6 = arith.constant 0 : index
    %c0_7 = arith.constant 0 : index
    %8 = vector.load %arg4[%c0_6, %c0_7] : memref<32x256xf32, #tpu.memory_space<vmem>>, vector<32x256xf32>
    %cst_8 = arith.constant dense<0.000000e+00> : vector<2x256xf32>
    %9 = tpu.matmul %7, %8, %cst_8 {dimension_numbers = #tpu.dot_dimension_numbers<[1], [0], [0], [1], [0, 0, 1, 1], [], []>} : vector<2x32xf32>, vector<32x256xf32>, vector<2x256xf32> -> vector<2x256xf32>
    %c0_9 = arith.constant 0 : index
    %c0_10 = arith.constant 0 : index
    %10 = vector.load %arg5[%c0_9, %c0_10] : memref<1x256xf32, #tpu.memory_space<vmem>>, vector<1x256xf32>
    %11 = vector.broadcast %10 : vector<1x256xf32> to vector<2x256xf32>
    %12 = arith.addf %9, %11 : vector<2x256xf32>
    %c0_11 = arith.constant 0 : index
    %c0_12 = arith.constant 0 : index
    %13 = vector.load %arg6[%c0_11, %c0_12] : memref<2x256xf32, #tpu.memory_space<vmem>>, vector<2x256xf32>
    tpu.vector_store %arg6[%c0_11, %c0_12], %12 {strides = array<i32>} : memref<2x256xf32, #tpu.memory_space<vmem>>, vector<2x256xf32>,
    return
  }
  func.func @transform_0(%arg0: i32) -> (i32, i32) {
    %c0_i32 = arith.constant 0 : i32
    %c0_i32_0 = arith.constant 0 : i32
    return %arg0, %c0_i32 : i32, i32
  }
  func.func @transform_1(%arg0: i32) -> (i32, i32) {
    %c0_i32 = arith.constant 0 : i32
    %c0_i32_0 = arith.constant 0 : i32
    %c0_i32_1 = arith.constant 0 : i32
    return %c0_i32, %c0_i32_0 : i32, i32
  }
  func.func @transform_2(%arg0: i32) -> (i32, i32) {
    %c0_i32 = arith.constant 0 : i32
    %c0_i32_0 = arith.constant 0 : i32
    %c0_i32_1 = arith.constant 0 : i32
    return %c0_i32, %c0_i32_0 : i32, i32
  }
  func.func @transform_3(%arg0: i32) -> (i32, i32) {
    %c0_i32 = arith.constant 0 : i32
    %c0_i32_0 = arith.constant 0 : i32
    %c0_i32_1 = arith.constant 0 : i32
    return %c0_i32, %c0_i32_0 : i32, i32
  }
  func.func @transform_4(%arg0: i32) -> (i32, i32) {
    %c0_i32 = arith.constant 0 : i32
    %c0_i32_0 = arith.constant 0 : i32
    %c0_i32_1 = arith.constant 0 : i32
    return %c0_i32, %c0_i32_0 : i32, i32
  }
  func.func @transform_5(%arg0: i32) -> (i32, i32) {
    %c0_i32 = arith.constant 0 : i32
    %c0_i32_0 = arith.constant 0 : i32
    return %arg0, %c0_i32 : i32, i32
  }
}

</mosaic_0001>

<bundles_post_ra>
// kernel: tpu_custom_call.1
= control target key start
LH: loop header
LB: loop body
LE: loop exit
PB: predicated region body
PF: predicated region fallthrough
CT: control target
= control target key end

     0   :  { %10 = vsyncpa [#allocation3], 0  ;;  %s478_s0 = inlined_call_operand.hbm [shape: f32[2,8], index: 0, kind: input, shape index: {}]   ;;  %s479_s1 = inlined_call_operand.hbm [shape: f32[8,32], index: 1, kind: input, shape index: {}]   ;;  %s480_s2 = inlined_call_operand.vmem [shape: f32[1,32], index: 2, kind: input, shape index: {}]   ;;  %s481_s3 = inlined_call_operand.hbm [shape: f32[32,256], index: 3, kind: input, shape index: {}]   ;;  %s482_s4 = inlined_call_operand.vmem [shape: f32[1,256], index: 4, kind: input, shape index: {}]   ;;  %s483_s5 = inlined_call_operand.hbm [shape: f32[2,256], index: 5, kind: output, shape index: {}]  }
   0x1   :  { %11 = vsyncpa [#allocation6], 0 }
   0x2   :  { %12 = vsyncpa [#allocation4], 0  ;;  %s386_s18 = smov [#allocation5]   ;;  %s387_s20 = smov [#allocation2]  }
   0x3   :  { %s29_s19 = sshll.u32 %s386_s18, 4  ;;  %s19_s21 = sshll.u32 %s387_s20, 4  ;;  %s30_s19 = int_to_ptr.vmem [resolvable:$true] %s29_s19  ;;  %s20_s21 = int_to_ptr.vmem [resolvable:$true] %s19_s21 }
   0x4   :  { %s292_s24 = scalar_lea.hbm %s479_s1, 128 }
   0x5   :  { %p293_p0 = scmp.ne.s32.totalorder %s479_s1, %s292_s24  ;;  %p296_p1 = scmp.lt.u32.totalorder %s292_s24, %s479_s1 }
   0x7   :  { %p298_p2 = pnand %p296_p1, %p293_p0 }
   0x9   :  { %301 = shalt.err (!%p298_p2)
}
   0xa   :  { %s302_s29 = scalar_lea.vmem %s30_s19, 128  ;;  %p307_p4 = scmp.lt.s32.totalorder %s30_s19, %s30_s19 }
   0xb   :  { %p303_p3 = scmp.ne.s32.totalorder %s30_s19, %s302_s29  ;;  %p308_p5 = scmp.lt.s32.totalorder %s302_s29, %s302_s29 }
   0xd   :  { %p309_p6 = por %p308_p5, %p307_p4 }
   0xf   :  { %p310_p7 = pnand %p309_p6, %p303_p3 }
  0x11   :  { %313 = shalt.err (!%p310_p7)
}
  0x12   :  { %32 = dma.hbm_to_vmem [thread:$0]  %s479_s1, 128, %s30_s19, [#allocation6]  }
  0x13   :  { %s314_s9 = scalar_lea.hbm %s478_s0, 32 }
  0x14   :  { %p315_p8 = scmp.ne.s32.totalorder %s478_s0, %s314_s9  ;;  %p318_p9 = scmp.lt.u32.totalorder %s314_s9, %s478_s0 }
  0x16   :  { %p320_p10 = pnand %p318_p9, %p315_p8 }
  0x18   :  { %323 = shalt.err (!%p320_p10)
}
  0x19   :  { %s324_s14 = scalar_lea.vmem %s20_s21, 32  ;;  %p329_p12 = scmp.lt.s32.totalorder %s20_s21, %s20_s21 }
  0x1a   :  { %p325_p11 = scmp.ne.s32.totalorder %s20_s21, %s324_s14  ;;  %p330_p13 = scmp.lt.s32.totalorder %s324_s14, %s324_s14 }
  0x1c   :  { %p331_p0 = por %p330_p13, %p329_p12 }
  0x1e   :  { %p332_p1 = pnand %p331_p0, %p325_p11 }
  0x20   :  { %335 = shalt.err (!%p332_p1)
}
  0x21   :  { %22 = dma.hbm_to_vmem [thread:$0]  %s478_s0, 32, %s20_s21, [#allocation3]  }
  0x22   :  { %s388_s16 = smov [#allocation7]   ;;  %s336_s20 = scalar_lea.hbm %s481_s3, 1024 }
  0x23   :  { %s40_s17 = sshll.u32 %s388_s16, 4  ;;  %p337_p2 = scmp.ne.s32.totalorder %s481_s3, %s336_s20  ;;  %s41_s17 = int_to_ptr.vmem [resolvable:$true] %s40_s17 }
  0x24   :  { %p340_p3 = scmp.lt.u32.totalorder %s336_s20, %s481_s3 }
  0x26   :  { %p342_p4 = pnand %p340_p3, %p337_p2 }
  0x28   :  { %345 = shalt.err (!%p342_p4)
}
  0x29   :  { %s346_s26 = scalar_lea.vmem %s41_s17, 1024  ;;  %p351_p6 = scmp.lt.s32.totalorder %s41_s17, %s41_s17 }
  0x2a   :  { %p347_p5 = scmp.ne.s32.totalorder %s41_s17, %s346_s26  ;;  %p352_p7 = scmp.lt.s32.totalorder %s346_s26, %s346_s26 }
  0x2c   :  { %p353_p8 = por %p352_p7, %p351_p6 }
  0x2e   :  { %p354_p9 = pnand %p353_p8, %p347_p5 }
  0x30   :  { %357 = shalt.err (!%p354_p9)
}
  0x31   :  { %s389_s0 = smov 256   ;;  %s390_s21 = smov 16  }
  0x32   :  { %46 = dma.hbm_to_vmem [thread:$0]  %s481_s3, 1024, %s41_s17, [#allocation6], %s389_s0, %s389_s0, %s390_s21  }
  0x33   :  { %380 = dma.done.wait [#allocation3], 32  }
  0x34   :  { %381 = vsyncadd [#allocation3], 4294967264 }
  0x35   :  { %382 = dma.done.wait [#allocation6], 1152  }
  0x36   :  { %383 = vsyncadd [#allocation6], 4294966144  ;;  %v391_v0 = vmov 0.0   ;;  %vm392_vm0 = vmmov 0   ;;  %vm67_vm1 = vcmask 64512   ;;  %v59_v1 = vld [vmem:[#allocation5] sm:$0xff]  ;;  %v152_v20 = vlaneseq }
  0x37   :  { %271 = vmatprep.subr.mxu0 %v391_v0  ;;  %273 = vmatprep.mubr.msk.f32.mxu0 %vm392_vm0, %v391_v0  ;;  %v58_v2 = vld [vmem:[#allocation2] sm:$0x3]  ;;  %v143_v3 = vld [vmem:[#allocation7 + $0x8] sm:$0xff]  ;;  %v145_v4 = vld [vmem:[#allocation7 + $0x18] sm:$0xff]  ;;  %vm162_vm2 = vcmask 261120  }
  0x38   :  { %230 = vmatprep.mubr.f32.mxu1 %v391_v0  ;;  %272 = vmatpush3.msra.mxu0 %v59_v1  ;;  %v142_v5 = vld [vmem:[#allocation7] sm:$0xff]  ;;  %v144_v6 = vld [vmem:[#allocation7 + $0x10] sm:$0xff]  ;;  %v276_v7 = vpack.c.bf16 %v145_v4, %v143_v3  ;;  %v147_v9 = vld [vmem:[#allocation7 + $0x28] sm:$0xff]  ;;  %v153_v21 = vshrl.u32 %v152_v20, 7 }
  0x39   :  { %274 = vmatmul.mubr.msk.f32.vlgmr.msra.gmra.mrb[0].mxu0 %vm67_vm1, %v58_v2  ;;  %v278_v8 = vpack.c.bf16 %v144_v6, %v142_v5  ;;  %v149_v10 = vld [vmem:[#allocation7 + $0x38] sm:$0xff]  ;;  %v146_v12 = vld [vmem:[#allocation7 + $0x20] sm:$0xff]  ;;  %v148_v13 = vld [vmem:[#allocation7 + $0x30] sm:$0xff] }
  0x3a   :  { %277 = vmatprep.subr.bf16.mxu1 %v276_v7  ;;  %v280_v11 = vpack.c.bf16 %v149_v10, %v147_v9  ;;  %v282_v14 = vpack.c.bf16 %v148_v13, %v146_v12  ;;  %v265_v15 = vld [vmem:[%s480_s2] ss:$0 sm:$0xff]  ;;  %v154_v22 = vsub.s32 0, %v153_v21  ;;  %v158_v24 = vsub.s32 1, %v153_v21  ;;  %s393_s2 = smov [#allocation8]  }
  0x3b   :  { %279 = vmatpush1.bf16.msra.mxu1 %v278_v8  ;;  %v150_v23 = vld [vmem:[%s482_s4] sm:$0x3]  ;;  %s255_s7 = sshll.u32 %s393_s2, 4  ;;  %s256_s7 = int_to_ptr.vmem [resolvable:$true] %s255_s7 }
  0x3c   :  { %281 = vmatprep.subr.bf16.mxu1 %v280_v11  ;;  %v155_v25 = vrot.slane %v150_v23, %v154_v22  ;;  %v159_v26 = vrot.slane %v150_v23, %v158_v24  ;;  %s358_s8 = scalar_lea.vmem %s256_s7, 64  ;;  %p363_p11 = scmp.lt.s32.totalorder %s256_s7, %s256_s7 }
  0x3d   :  { %p359_p10 = scmp.ne.s32.totalorder %s256_s7, %s358_s8  ;;  %p364_p12 = scmp.lt.s32.totalorder %s358_s8, %s358_s8 }
  0x3f   :  { %283 = vmatpush1.bf16.msra.mxu1 %v282_v14  ;;  %p365_p13 = por %p364_p12, %p363_p11 }
  0x41   :  { %p366_p0 = pnand %p365_p13, %p359_p10 }
 0x10c   :  { %v137_v16 = vpop.f32.mrb[0].mxu0 }
 0x10d   :  { %v138_v17 = vadd.f32 %v265_v15, %v137_v16  ;;  %v275_v18 = vpop.f32.mrb[1].mxu0 }
 0x10f   :  { %v141_v19 = vmax.f32 %v138_v17, 0.0 }
 0x111   :  { %267 = vmatmul.mubr.msk.f32.vlgmr.msra.gmra.mrb[0].mxu1 %vm162_vm2, %v141_v19 }
 0x1e4   :  { %v232_v27 = vpop.f32.mrb[0].mxu1 }
 0x1e5   :  { %v233_v28 = vadd.f32 %v232_v27, %v155_v25  ;;  %v234_v29 = vpop.f32.mrb[1].mxu1 }
 0x1e6   :  { %v235_v30 = vadd.f32 %v234_v29, %v159_v26 }
 0x1e8   :  { %v239_v31 = vcombine.low %v233_v28, %v235_v30 }
 0x1ea   :  { %268 = vst.sshfl [vmem:[#allocation8] sm:$0x33 pattern:$0x76325410] %v239_v31 }
 0x1eb   :  { %369 = shalt.err (!%p366_p0)
}
 0x1ec   :  { %s370_s10 = scalar_lea.hbm %s483_s5, 64 }
 0x1ed   :  { %p371_p1 = scmp.ne.s32.totalorder %s483_s5, %s370_s10  ;;  %p374_p2 = scmp.lt.u32.totalorder %s370_s10, %s483_s5 }
 0x1ef   :  { %p376_p3 = pnand %p374_p2, %p371_p1 }
 0x1f1   :  { %379 = shalt.err (!%p376_p3)
}
 0x1f2   :  { %258 = dma.vmem_to_hbm [thread:$0]  %s256_s7, 64, %s483_s5, [#allocation4]  }
 0x1f3   :  { %384 = dma.done.wait [#allocation4], 64  }
 0x1f4   :  { %385 = vsyncadd [#allocation4], 4294967232 }
 0x1f5   :  { %262 = vsyncpa [#allocation3], 1 }
 0x1f6   :  { %263 = vsyncpa [#allocation6], 1 }
 0x1f7   :  { %264 = vsyncpa [#allocation4], 1 }

</bundles_post_ra>
